<compile_context>
chip_gen: v5e
topology: v5e:2x2
jax: 0.10.0
libtpu: 0.0.40
codegen_flags: <defaults>
</compile_context>

<pallas_src>
import math

import jax
import jax.numpy as jnp
from jax.experimental import pallas as pl
from jax.experimental.pallas import tpu as pltpu

_TARGET_TILE_ELEMS = 1024 * 512          # ~2 MiB per f32 tile
_TWO_PI = 2.0 * math.pi
_HASH_A = -1640531535                    # 2654435761  (Knuth) as int32
_HASH_B = -1640531527                    # 0x9E3779B9 (golden)  as int32


def _round_up(a, b):
    return (a + b - 1) // b * b


def _additive_noise_tpu_kernel(seed_ref, params_ref, x_ref, o_ref):
    """o = x + mean + std * N(0,1); noise generated on-chip (Box-Muller)."""
    # Decorrelated per-tile stream: hash-mix seed with tile index (int32 wrap is fine).
    pltpu.prng_seed(seed_ref[0] * jnp.int32(_HASH_A)
                    + pl.program_id(0) * jnp.int32(_HASH_B))

    tr, c = x_ref.shape
    h1 = (tr + 1) // 2            # rows produced by the cos branch
    h2 = tr - h1                  # rows produced by the sin branch

    exp_one = jnp.uint32(0x3F800000)
    bits1 = pltpu.bitcast(pltpu.prng_random_bits((h1, c)), jnp.uint32)
    bits2 = pltpu.bitcast(pltpu.prng_random_bits((h1, c)), jnp.uint32)
    # Mantissa-bitcast uniforms: top 23 bits -> f32 in [1, 2); no int->f32 convert.
    u1 = 2.0 - pltpu.bitcast((bits1 >> 9) | exp_one, jnp.float32)   # (0, 1]  log-safe
    u2 = pltpu.bitcast((bits2 >> 9) | exp_one, jnp.float32) - 1.0   # [0, 1)

    mean = params_ref[0]
    std = params_ref[1]

    rs = std * jnp.sqrt(-2.0 * jnp.log(u1))      # std folded into the radius
    theta = jnp.float32(_TWO_PI) * u2

    # Store both Box-Muller branches directly into the two output halves
    # (no concatenate, no full-tile noise temporary); add in f32, cast back.
    o_ref[:h1, :] = (x_ref[:h1, :].astype(jnp.float32)
                     + (mean + rs * jnp.cos(theta))).astype(o_ref.dtype)
    if h2 > 0:   # static (trace-time) check; h2 == 0 only for 1-row tiles
        o_ref[h1:, :] = (x_ref[h1:, :].astype(jnp.float32)
                         + (mean + rs[:h2, :] * jnp.sin(theta[:h2, :]))
                         ).astype(o_ref.dtype)


def _add_noise_kernel(x_ref, noise_ref, o_ref):
    """Portable fallback: o = x + precomputed_noise (same tiling as the TPU path)."""
    o_ref[...] = (x_ref[...].astype(jnp.float32) + noise_ref[...]).astype(o_ref.dtype)


def _choose_layout(n):
    """Pick (cols, pad) so flat n elements reshape to a lane-dense 2-D slab
    with ZERO padding whenever n is a multiple of 128 (the common NN case)."""
    for cols in (512, 256, 128):
        if n % cols == 0:
            return cols, 0
    if n < 128:
        return n, 0                          # tiny tensor: single (1, n) block
    # TODO(synk): rare residual pad (<128 elems) still costs one copy pass;
    # a fully manual pl.ANY + bounded-DMA tail path would remove it.
    cols = 128
    return cols, _round_up(n, cols) - n


def additive_gaus_noise(x, mean, std, seed, training=True):
    """Forward pass of AdditiveGausNoise.

    training=True  -> x + Normal(mean, std).sample(x.shape)
    training=False -> x (identity)
    """
    if not training:
        return x

    orig_shape = x.shape
    orig_dtype = x.dtype
    n = x.size

    cols, pad = _choose_layout(n)
    flat = x.reshape(-1)
    if pad:
        flat = jnp.pad(flat, (0, pad))
    rows = (n + pad) // cols
    x2 = flat.reshape(rows, cols)            # layout-only reshape (free)

    max_tile_rows = max(8, _TARGET_TILE_ELEMS // cols)   # multiple of 8 for cols>=128
    tile_rows = rows if rows <= max_tile_rows else max_tile_rows
    grid = (pl.cdiv(rows, tile_rows),)       # ragged last block handled by Pallas
    blk = pl.BlockSpec((tile_rows, cols), lambda i: (i, 0))
    out_shape = jax.ShapeDtypeStruct((rows, cols), orig_dtype)

    if jax.default_backend() == "tpu":
        seed_arr = jnp.asarray([seed], dtype=jnp.int32)
        params = jnp.asarray([mean, std], dtype=jnp.float32)
        out2 = pl.pallas_call(
            _additive_noise_tpu_kernel,
            out_shape=out_shape,
            grid=grid,
            in_specs=[
                pl.BlockSpec(memory_space=pltpu.SMEM),   # seed scalar
                pl.BlockSpec(memory_space=pltpu.SMEM),   # [mean, std] scalars
                blk,                                     # x tile
            ],
            out_specs=blk,
            compiler_params=pltpu.CompilerParams(
                dimension_semantics=("parallel",),       # shard tiles across TCs (v7x)
                vmem_limit_bytes=32 * 1024 * 1024,       # ample for 2 MiB double-buffered tiles
            ),
        )(seed_arr, params, x2)
    else:
        # Non-TPU backend: hardware PRNG primitives unavailable; generate the
        # normal field with jax.random and fuse the add with identical tiling.
        z = jax.random.normal(jax.random.PRNGKey(seed), (rows, cols), dtype=jnp.float32)
        noise = jnp.float32(mean) + jnp.float32(std) * z
        out2 = pl.pallas_call(
            _add_noise_kernel,
            out_shape=out_shape,
            grid=grid,
            in_specs=[blk, blk],
            out_specs=blk,
        )(x2, noise)

    out_flat = out2.reshape(-1)
    if pad:
        out_flat = out_flat[:n]
    return out_flat.reshape(orig_shape)


if __name__ == "__main__":
    key = jax.random.PRNGKey(0)
    # Small NCHW input
    x = jax.random.normal(key, (2, 4, 16, 16), dtype=jnp.float32)

    mean, std = 0.0, 0.1

    # training mode: noise generated and added inside the Pallas kernel
    y_train = jax.block_until_ready(
        additive_gaus_noise(x, mean, std, seed=1234, training=True))

    # eval mode: identity
    y_eval = jax.block_until_ready(
        additive_gaus_noise(x, mean, std, seed=1234, training=False))

    assert y_train.shape == x.shape and y_train.dtype == x.dtype
    assert jnp.array_equal(y_eval, x)

    # sanity: added noise has roughly the requested statistics
    noise = y_train - x
    assert abs(float(jnp.mean(noise)) - mean) < 0.05
    assert abs(float(jnp.std(noise)) - std) < 0.05

    print("KERNEL_OK")
</pallas_src>

<mosaic_0001>
module attributes {stable_mosaic.version = 11 : i64} {
  func.func @_add_noise_kernel(%arg0: i32, %arg1: memref<4x512xf32, #tpu.memory_space<vmem>>, %arg2: memref<4x512xf32, #tpu.memory_space<vmem>>, %arg3: memref<4x512xf32, #tpu.memory_space<vmem>>) attributes {dimension_semantics = [#tpu.dimension_semantics<arbitrary>], iteration_bounds = array<i64: 1>, scalar_prefetch = 0 : i64, scratch_operands = 0 : i64, tpu.core_type = #tpu.core_type<tc>, window_params = [{transform_indices = @transform_0, window_bounds = array<i64: 4, 512>}, {transform_indices = @transform_1, window_bounds = array<i64: 4, 512>}, {transform_indices = @transform_2, window_bounds = array<i64: 4, 512>}]} {
    %c0 = arith.constant 0 : index
    %c0_0 = arith.constant 0 : index
    %0 = vector.load %arg1[%c0, %c0_0] : memref<4x512xf32, #tpu.memory_space<vmem>>, vector<4x512xf32>
    %c0_1 = arith.constant 0 : index
    %c0_2 = arith.constant 0 : index
    %1 = vector.load %arg2[%c0_1, %c0_2] : memref<4x512xf32, #tpu.memory_space<vmem>>, vector<4x512xf32>
    %2 = arith.addf %0, %1 : vector<4x512xf32>
    %c0_3 = arith.constant 0 : index
    %c0_4 = arith.constant 0 : index
    %3 = vector.load %arg3[%c0_3, %c0_4] : memref<4x512xf32, #tpu.memory_space<vmem>>, vector<4x512xf32>
    tpu.vector_store %arg3[%c0_3, %c0_4], %2 {strides = array<i32>} : memref<4x512xf32, #tpu.memory_space<vmem>>, vector<4x512xf32>,
    return
  }
  func.func @transform_0(%arg0: i32) -> (i32, i32) {
    %c0_i32 = arith.constant 0 : i32
    %c0_i32_0 = arith.constant 0 : i32
    return %arg0, %c0_i32 : i32, i32
  }
  func.func @transform_1(%arg0: i32) -> (i32, i32) {
    %c0_i32 = arith.constant 0 : i32
    %c0_i32_0 = arith.constant 0 : i32
    return %arg0, %c0_i32 : i32, i32
  }
  func.func @transform_2(%arg0: i32) -> (i32, i32) {
    %c0_i32 = arith.constant 0 : i32
    %c0_i32_0 = arith.constant 0 : i32
    return %arg0, %c0_i32 : i32, i32
  }
}

</mosaic_0001>

<bundles_post_ra>
// kernel: tpu_custom_call.1
= control target key start
LH: loop header
LB: loop body
LE: loop exit
PB: predicated region body
PF: predicated region fallthrough
CT: control target
= control target key end

     0   :  { %7 = vsyncpa [#allocation3], 0  ;;  %s174_s0 = inlined_call_operand.hbm [shape: f32[4,512], index: 0, kind: input, shape index: {}]   ;;  %s175_s1 = inlined_call_operand.hbm [shape: f32[4,512], index: 1, kind: input, shape index: {}]   ;;  %s176_s2 = inlined_call_operand.hbm [shape: f32[4,512], index: 2, kind: output, shape index: {}]  }
   0x1   :  { %8 = vsyncpa [#allocation6], 0 }
   0x2   :  { %9 = vsyncpa [#allocation4], 0  ;;  %s15_s11 = sshll.u32 %s174_s0, 4  ;;  %s147_s12 = smov [#allocation2]   ;;  %s16_s11 = int_to_ptr.hbm [resolvable:$true] %s15_s11 }
   0x3   :  { %s17_s13 = sshll.u32 %s147_s12, 4  ;;  %s26_s16 = sshll.u32 %s175_s1, 4  ;;  %s18_s13 = int_to_ptr.vmem [resolvable:$true] %s17_s13  ;;  %s27_s16 = int_to_ptr.hbm [resolvable:$true] %s26_s16 }
   0x4   :  { %20 = dma.hbm_to_vmem [thread:$0]  %s16_s11, 256, %s18_s13, [#allocation3]  }
   0x5   :  { %s148_s17 = smov [#allocation5]  }
   0x6   :  { %s28_s18 = sshll.u32 %s148_s17, 4  ;;  %s29_s18 = int_to_ptr.vmem [resolvable:$true] %s28_s18 }
   0x7   :  { %31 = dma.hbm_to_vmem [thread:$0]  %s27_s16, 256, %s29_s18, [#allocation6]  }
   0x8   :  { %141 = dma.done.wait [#allocation3], 256  }
   0x9   :  { %142 = vsyncadd [#allocation3], 4294967040 }
   0xa   :  { %143 = dma.done.wait [#allocation6], 256  }
   0xb   :  { %144 = vsyncadd [#allocation6], 4294967040  ;;  %s149_s19 = smov [#allocation7]   ;;  %s55_s22 = sshll.u32 %s176_s2, 4  ;;  %v40_v0 = vld [vmem:[#allocation2] sm:$0xff]  ;;  %v42_v1 = vld [vmem:[#allocation5] sm:$0xff]  ;;  %s56_s22 = int_to_ptr.hbm [resolvable:$true] %s55_s22 }
   0xc   :  { %s53_s0 = sshll.u32 %s149_s19, 4  ;;  %v41_v2 = vld [vmem:[#allocation2 + $0x8] sm:$0xff]  ;;  %v44_v3 = vadd.f32 %v42_v1, %v40_v0  ;;  %v43_v4 = vld [vmem:[#allocation5 + $0x8] sm:$0xff]  ;;  %s54_s0 = int_to_ptr.vmem [resolvable:$true] %s53_s0 }
   0xd   :  { %v45_v5 = vadd.f32 %v43_v4, %v41_v2 }
   0xe   :  { %46 = vst [vmem:[#allocation7] sm:$0xff] %v44_v3 }
   0xf   :  { %47 = vst [vmem:[#allocation7 + $0x8] sm:$0xff] %v45_v5 }
  0x10   :  { %58 = dma.vmem_to_hbm [thread:$0]  %s54_s0, 256, %s56_s22, [#allocation4]  }
  0x11   :  { %145 = dma.done.wait [#allocation4], 256  }
  0x12   :  { %146 = vsyncadd [#allocation4], 4294967040 }
  0x13   :  { %63 = vsyncpa [#allocation3], 1 }
  0x14   :  { %64 = vsyncpa [#allocation6], 1 }
  0x15   :  { %65 = vsyncpa [#allocation4], 1 }

</bundles_post_ra>
